<compile_context>
chip_gen: v7x
topology: tpu7x:2x2x1
jax: 0.10.0
libtpu: 0.0.40
codegen_flags: <defaults>
</compile_context>

<pallas_src>
import jax
import jax.numpy as jnp
from jax.experimental import pallas as pl
from jax.experimental.pallas import tpu as pltpu


def _mask_mul_kernel(mask_ref, x_ref, o_ref):
    # elementwise: out = mask * x (VPU); mask widened in-kernel (free cast,
    # hidden under the DMA) so a narrow int8/bool mask costs 1 byte/elem HBM.
    x = x_ref[...]
    o_ref[...] = mask_ref[...].astype(x.dtype) * x


def _sublane_min(dtype) -> int:
    """Minimum sublane tile for this dtype (keeps packed layouts packed)."""
    return {4: 8, 2: 16, 1: 32}.get(jnp.dtype(dtype).itemsize, 8)


def _pick_cols(total: int, max_cols: int = 2048) -> int:
    """Largest multiple of 128 that divides `total` (0 if none)."""
    best = 0
    c = 128
    while c <= max_cols:
        if total % c == 0:
            best = c
        c += 128
    return best


def _cdiv(a: int, b: int) -> int:
    return -(-a // b)


def _round_up(a: int, b: int) -> int:
    return _cdiv(a, b) * b


# Below this x-size we skip the grid entirely (single un-tiled call).
_SMALL_BYTES = 2 * 1024 * 1024


def _vmem_config():
    """Generation-aware (vmem_limit_bytes, per-step working-set budget)."""
    try:
        cap = pltpu.get_tpu_info().vmem_capacity_bytes
    except Exception:
        cap = 64 * 1024 * 1024  # conservative fallback: assume v7x-sized VMEM
    if cap >= 96 * 1024 * 1024:
        # v5e / v6e: 128 MiB physical VMEM -> 8 MiB f32 tiles double-buffered.
        return 64 * 1024 * 1024, 48 * 1024 * 1024
    # v7x: 64 MiB per TensorCore -> keep headroom for compiler scratch.
    return 42 * 1024 * 1024, 34 * 1024 * 1024


def _in_spec(shape, index_map, nbuf):
    """Input BlockSpec, optionally with deeper pipelining."""
    if nbuf != 2:
        try:
            return pl.BlockSpec(shape, index_map, pipeline_mode=pl.Buffered(nbuf))
        except (TypeError, AttributeError):
            pass
    return pl.BlockSpec(shape, index_map)


def fake_sparse_weight(mask: jax.Array, x: jax.Array,
                       *, donate_x: bool = False) -> jax.Array:
    """FakeSparseWeight.forward: returns mask * x (same shape/dtype as x).

    `donate_x=True` aliases the output onto x's buffer; only safe if the
    caller actually donates x (jit donate_argnums) and never reuses it.
    """
    assert mask.shape == x.shape, "mask must have the same shape as x"
    orig_shape = x.shape
    dtype = x.dtype

    # Bool masks: keep them narrow (1 byte) but as int8 for robust vector
    # layout; the widening to x.dtype happens inside the kernel.
    if mask.dtype == jnp.bool_:
        mask = mask.astype(jnp.int8)

    x_it = jnp.dtype(dtype).itemsize
    m_it = jnp.dtype(mask.dtype).itemsize
    total = x.size

    cols = _pick_cols(total)
    if total == 0 or cols == 0:
        # Element count not a multiple of 128 (rare: odd biases): one fused
        # XLA elementwise pass is already minimal HBM traffic; any pad/slice
        # or prefix+concat Pallas path would only ADD full-tensor passes.
        return (mask.astype(dtype) * x).reshape(orig_shape)

    rows = total // cols
    m2 = mask.reshape(rows, cols)   # free bitcast reshapes (row-major)
    x2 = x.reshape(rows, cols)

    io_alias = {1: 0} if donate_x else {}
    cost = pl.CostEstimate(flops=total, transcendentals=0,
                           bytes_accessed=total * (m_it + 2 * x_it))
    vmem_limit, step_budget = _vmem_config()

    if total * x_it <= _SMALL_BYTES:
        # Tiny weights: single un-tiled invocation, whole slab in VMEM.
        out2 = pl.pallas_call(
            _mask_mul_kernel,
            out_shape=jax.ShapeDtypeStruct((rows, cols), dtype),
            input_output_aliases=io_alias,
            cost_estimate=cost,
            compiler_params=pltpu.CompilerParams(
                vmem_limit_bytes=32 * 1024 * 1024),
        )(m2, x2)
    else:
        # Tiled path: 1-D parallel grid over rows, full lane-dense columns.
        sub = max(_sublane_min(dtype), _sublane_min(mask.dtype))

        # Largest row-tile whose double-buffered working set fits the budget.
        db_row_bytes = cols * 2 * (m_it + 2 * x_it)
        budget_tile_r = max(sub, (step_budget // db_row_bytes) // sub * sub)

        # Never collapse the grid: target >=4 steps (>=2 for small row
        # counts) so DMA/compute/writeback overlap and v7x's two TensorCores
        # both get work.
        tile_r = min(budget_tile_r, _round_up(_cdiv(rows, 4), sub))
        tile_r = max(sub, tile_r)

        # Re-balance so blocks divide rows as evenly as possible: full,
        # sublane-aligned blocks keep stores on the unmasked lane-dense path.
        steps = _cdiv(rows, tile_r)
        tile_r = _round_up(_cdiv(rows, steps), sub)
        grid = (_cdiv(rows, tile_r),)

        # Triple-buffer the two inputs when there is VMEM headroom (hides
        # DMA-issue jitter on a pure-bandwidth stream).
        tb_bytes = tile_r * cols * (3 * (m_it + x_it) + 2 * x_it)
        nbuf = 3 if tb_bytes <= step_budget else 2

        out2 = pl.pallas_call(
            _mask_mul_kernel,
            out_shape=jax.ShapeDtypeStruct((rows, cols), dtype),
            grid_spec=pltpu.PrefetchScalarGridSpec(
                num_scalar_prefetch=0,
                grid=grid,
                in_specs=[
                    _in_spec((tile_r, cols), lambda i: (i, 0), nbuf),
                    _in_spec((tile_r, cols), lambda i: (i, 0), nbuf),
                ],
                out_specs=pl.BlockSpec((tile_r, cols), lambda i: (i, 0)),
            ),
            compiler_params=pltpu.CompilerParams(
                dimension_semantics=("parallel",),
                vmem_limit_bytes=vmem_limit),
            input_output_aliases=io_alias,
            cost_estimate=cost,
        )(m2, x2)

    return out2.reshape(orig_shape)


if __name__ == "__main__":
    key = jax.random.PRNGKey(0)
    k1, k2, k3, k4 = jax.random.split(key, 4)

    # 1) Small conv-weight-like tensor (OIHW), f32 mask: un-tiled small path.
    shape = (8, 4, 16, 16)
    x = jax.random.normal(k2, shape, dtype=jnp.float32)
    mask = jax.random.bernoulli(k1, p=0.5, shape=shape).astype(jnp.float32)
    out = jax.block_until_ready(fake_sparse_weight(mask, x))
    ref = mask * x
    assert out.shape == x.shape and out.dtype == x.dtype
    assert jnp.allclose(out, ref), "mismatch vs reference (small path)"

    # 2) Larger conv weight (~2.25 MiB f32) with a NARROW int8 mask widened
    #    inside the kernel: exercises the tiled, multi-step parallel path.
    shape2 = (256, 256, 3, 3)
    x2 = jax.random.normal(k4, shape2, dtype=jnp.float32)
    mask2 = jax.random.bernoulli(k3, p=0.5, shape=shape2).astype(jnp.int8)
    out2 = jax.block_until_ready(fake_sparse_weight(mask2, x2))
    ref2 = mask2.astype(jnp.float32) * x2
    assert out2.shape == x2.shape and out2.dtype == x2.dtype
    assert jnp.allclose(out2, ref2), "mismatch vs reference (tiled path)"

    # 3) Bias-like tensor whose element count is not a multiple of 128:
    #    single fused fallback pass (no pad/slice round trip).
    shape3 = (37,)
    x3 = jax.random.normal(k2, shape3, dtype=jnp.float32)
    mask3 = jax.random.bernoulli(k1, p=0.5, shape=shape3).astype(jnp.float32)
    out3 = jax.block_until_ready(fake_sparse_weight(mask3, x3))
    assert out3.shape == x3.shape and out3.dtype == x3.dtype
    assert jnp.allclose(out3, mask3 * x3), "mismatch vs reference (tail path)"

    print("KERNEL_OK")
</pallas_src>

<mosaic_0001>
module attributes {stable_mosaic.version = 11 : i64} {
  func.func @_mask_mul_kernel(%arg0: memref<4x2048xf32, #tpu.memory_space<vmem>>, %arg1: memref<4x2048xf32, #tpu.memory_space<vmem>>, %arg2: memref<4x2048xf32, #tpu.memory_space<vmem>>) attributes {dimension_semantics = [], scalar_prefetch = 0 : i64, scratch_operands = 0 : i64, tpu.core_type = #tpu.core_type<tc>} {
    %c0 = arith.constant 0 : index
    %c0_0 = arith.constant 0 : index
    %0 = vector.load %arg1[%c0, %c0_0] : memref<4x2048xf32, #tpu.memory_space<vmem>>, vector<4x2048xf32>
    %c0_1 = arith.constant 0 : index
    %c0_2 = arith.constant 0 : index
    %1 = vector.load %arg0[%c0_1, %c0_2] : memref<4x2048xf32, #tpu.memory_space<vmem>>, vector<4x2048xf32>
    %2 = arith.mulf %1, %0 : vector<4x2048xf32>
    %c0_3 = arith.constant 0 : index
    %c0_4 = arith.constant 0 : index
    %3 = vector.load %arg2[%c0_3, %c0_4] : memref<4x2048xf32, #tpu.memory_space<vmem>>, vector<4x2048xf32>
    tpu.vector_store %arg2[%c0_3, %c0_4], %2 {strides = array<i32>} : memref<4x2048xf32, #tpu.memory_space<vmem>>, vector<4x2048xf32>,
    return
  }
}

</mosaic_0001>

<bundles_post_ra>
// kernel: tpu_custom_call.1
= control target key start
LH: loop header
LB: loop body
LE: loop exit
PB: predicated region body
PF: predicated region fallthrough
CT: control target
= control target key end

     0   :  { %7 = vsyncpa [#allocation3], 0  ;;  %s213_s0 = inlined_call_operand.hbm [shape: f32[4,2048], index: 0, kind: input, shape index: {}]   ;;  %s214_s1 = inlined_call_operand.hbm [shape: f32[4,2048], index: 1, kind: input, shape index: {}]   ;;  %s215_s2 = inlined_call_operand.hbm [shape: f32[4,2048], index: 2, kind: output, shape index: {}]  }
   0x1   :  { %8 = vsyncpa [#allocation6], 0 }
   0x2   :  { %9 = vsyncpa [#allocation4], 0  ;;  %s159_s9 = smov [#allocation2]   ;;  %s160_s11 = smov [#allocation5]  }
   0x3   :  { %s16_s10 = sshll.u32 %s159_s9, 4  ;;  %s26_s12 = sshll.u32 %s160_s11, 4  ;;  %s17_s10 = int_to_ptr.vmem [resolvable:$true] %s16_s10  ;;  %s27_s12 = int_to_ptr.vmem [resolvable:$true] %s26_s12 }
   0x4   :  { %s87_s15 = scalar_lea.hbm %s213_s0, 1024 }
   0x5   :  { %p88_p0 = scmp.ne.s32.totalorder %s213_s0, %s87_s15  ;;  %p91_p1 = scmp.lt.u32.totalorder %s87_s15, %s213_s0 }
   0x7   :  { %p93_p2 = pnand %p91_p1, %p88_p0 }
   0x9   :  { %96 = shalt.err (!%p93_p2)
}
   0xa   :  { %s97_s20 = scalar_lea.vmem %s17_s10, 1024  ;;  %p102_p4 = scmp.lt.s32.totalorder %s17_s10, %s17_s10 }
   0xb   :  { %p98_p3 = scmp.ne.s32.totalorder %s17_s10, %s97_s20  ;;  %p103_p5 = scmp.lt.s32.totalorder %s97_s20, %s97_s20 }
   0xd   :  { %p104_p6 = por %p103_p5, %p102_p4 }
   0xf   :  { %p105_p7 = pnand %p104_p6, %p98_p3 }
  0x11   :  { %108 = shalt.err (!%p105_p7)
}
  0x12   :  { %19 = dma.hbm_to_vmem [thread:$0]  %s213_s0, 1024, %s17_s10, [#allocation3]  }
  0x13   :  { %s109_s25 = scalar_lea.hbm %s214_s1, 1024 }
  0x14   :  { %p110_p8 = scmp.ne.s32.totalorder %s214_s1, %s109_s25  ;;  %p113_p9 = scmp.lt.u32.totalorder %s109_s25, %s214_s1 }
  0x16   :  { %p115_p10 = pnand %p113_p9, %p110_p8 }
  0x18   :  { %118 = shalt.err (!%p115_p10)
}
  0x19   :  { %s119_s30 = scalar_lea.vmem %s27_s12, 1024  ;;  %p124_p12 = scmp.lt.s32.totalorder %s27_s12, %s27_s12 }
  0x1a   :  { %p120_p11 = scmp.ne.s32.totalorder %s27_s12, %s119_s30  ;;  %p125_p13 = scmp.lt.s32.totalorder %s119_s30, %s119_s30 }
  0x1c   :  { %p126_p0 = por %p125_p13, %p124_p12 }
  0x1e   :  { %p127_p1 = pnand %p126_p0, %p120_p11 }
  0x20   :  { %130 = shalt.err (!%p127_p1)
}
  0x21   :  { %29 = dma.hbm_to_vmem [thread:$0]  %s214_s1, 1024, %s27_s12, [#allocation6]  }
  0x22   :  { %153 = dma.done.wait [#allocation3], 1024  }
  0x23   :  { %154 = vsyncadd [#allocation3], 4294966272 }
  0x24   :  { %155 = dma.done.wait [#allocation6], 1024  }
  0x25   :  { %156 = vsyncadd [#allocation6], 4294966272  ;;  %v36_v0 = vld [vmem:[#allocation5] sm:$0xff]  ;;  %v37_v2 = vld [vmem:[#allocation5 + $0x8] sm:$0xff]  ;;  %s161_s1 = smov [#allocation7]  }
  0x26   :  { %v44_v1 = vld [vmem:[#allocation2] sm:$0xff]  ;;  %v45_v4 = vld [vmem:[#allocation2 + $0x8] sm:$0xff]  ;;  %v38_v5 = vld [vmem:[#allocation5 + $0x10] sm:$0xff]  ;;  %s74_s4 = sshll.u32 %s161_s1, 4  ;;  %s75_s4 = int_to_ptr.vmem [resolvable:$true] %s74_s4 }
  0x27   :  { %v52_v3 = vmul.f32 %v44_v1, %v36_v0  ;;  %v46_v6 = vld [vmem:[#allocation2 + $0x10] sm:$0xff]  ;;  %v53_v7 = vmul.f32 %v45_v4, %v37_v2  ;;  %v39_v9 = vld [vmem:[#allocation5 + $0x18] sm:$0xff]  ;;  %v40_v11 = vld [vmem:[#allocation5 + $0x20] sm:$0xff]  ;;  %s131_s5 = scalar_lea.vmem %s75_s4, 1024  ;;  %p136_p3 = scmp.lt.s32.totalorder %s75_s4, %s75_s4 }
  0x28   :  { %v54_v8 = vmul.f32 %v46_v6, %v38_v5  ;;  %v47_v10 = vld [vmem:[#allocation2 + $0x18] sm:$0xff]  ;;  %v48_v13 = vld [vmem:[#allocation2 + $0x20] sm:$0xff]  ;;  %v41_v14 = vld [vmem:[#allocation5 + $0x28] sm:$0xff]  ;;  %p132_p2 = scmp.ne.s32.totalorder %s75_s4, %s131_s5  ;;  %p137_p4 = scmp.lt.s32.totalorder %s131_s5, %s131_s5 }
  0x29   :  { %60 = vst [vmem:[#allocation7] sm:$0xff] %v52_v3  ;;  %v55_v12 = vmul.f32 %v47_v10, %v39_v9  ;;  %v49_v15 = vld [vmem:[#allocation2 + $0x28] sm:$0xff]  ;;  %61 = vst [vmem:[#allocation7 + $0x8] sm:$0xff] %v53_v7  ;;  %v56_v16 = vmul.f32 %v48_v13, %v40_v11  ;;  %v42_v18 = vld [vmem:[#allocation5 + $0x30] sm:$0xff] }
  0x2a   :  { %62 = vst [vmem:[#allocation7 + $0x10] sm:$0xff] %v54_v8  ;;  %v57_v17 = vmul.f32 %v49_v15, %v41_v14  ;;  %v50_v19 = vld [vmem:[#allocation2 + $0x30] sm:$0xff]  ;;  %v43_v20 = vld [vmem:[#allocation5 + $0x38] sm:$0xff]  ;;  %p138_p5 = por %p137_p4, %p136_p3 }
  0x2b   :  { %63 = vst [vmem:[#allocation7 + $0x18] sm:$0xff] %v55_v12  ;;  %v58_v21 = vmul.f32 %v50_v19, %v42_v18  ;;  %v51_v22 = vld [vmem:[#allocation2 + $0x38] sm:$0xff]  ;;  %64 = vst [vmem:[#allocation7 + $0x20] sm:$0xff] %v56_v16 }
  0x2c   :  { %65 = vst [vmem:[#allocation7 + $0x28] sm:$0xff] %v57_v17  ;;  %v59_v23 = vmul.f32 %v51_v22, %v43_v20  ;;  %p139_p6 = pnand %p138_p5, %p132_p2 }
  0x2d   :  { %66 = vst [vmem:[#allocation7 + $0x30] sm:$0xff] %v58_v21 }
  0x2e   :  { %67 = vst [vmem:[#allocation7 + $0x38] sm:$0xff] %v59_v23 }
  0x2f   :  { %142 = shalt.err (!%p139_p6)
}
  0x30   :  { %s143_s8 = scalar_lea.hbm %s215_s2, 1024 }
  0x31   :  { %p144_p7 = scmp.ne.s32.totalorder %s215_s2, %s143_s8  ;;  %p147_p8 = scmp.lt.u32.totalorder %s143_s8, %s215_s2 }
  0x33   :  { %p149_p9 = pnand %p147_p8, %p144_p7 }
  0x35   :  { %152 = shalt.err (!%p149_p9)
}
  0x36   :  { %77 = dma.vmem_to_hbm [thread:$0]  %s75_s4, 1024, %s215_s2, [#allocation4]  }
  0x37   :  { %157 = dma.done.wait [#allocation4], 1024  }
  0x38   :  { %158 = vsyncadd [#allocation4], 4294966272 }
  0x39   :  { %81 = vsyncpa [#allocation3], 1 }
  0x3a   :  { %82 = vsyncpa [#allocation6], 1 }
  0x3b   :  { %83 = vsyncpa [#allocation4], 1 }

</bundles_post_ra>
